<compile_context>
chip_gen: v7x
topology: tpu7x:2x2x1
jax: 0.10.0
libtpu: 0.0.40
codegen_flags: <defaults>
</compile_context>

<pallas_src>
import jax
import jax.numpy as jnp
from jax.experimental import pallas as pl
from jax.experimental.pallas import tpu as pltpu


def _patch_proj_kernel(p_ref, w_ref, b_ref, o_ref):
    # p_ref: (tm, dim)  w_ref: (dim, d_model)  b_ref: (1, d_model)
    acc = jnp.dot(p_ref[...], w_ref[...], preferred_element_type=jnp.float32)
    o_ref[...] = (acc + b_ref[...]).astype(o_ref.dtype)


def patch_embed_forward(x, w, b, *, pt, pf, tile_m=256):
    """PatchEmbed forward.

    x: (B, T, F)  w: (d_model, dim) PyTorch Linear weight  b: (d_model,)
    returns (B, N, d_model) with N = (T // pt) * (F // pf), dim = pt * pf.
    """
    B, T, F = x.shape
    d_model, dim = w.shape
    assert dim == pt * pf

    Tt = (T // pt) * pt
    Ft = (F // pf) * pf
    Nt, Nf = Tt // pt, Ft // pf
    N = Nt * Nf
    M = B * N

    # ---- layout plumbing in the wrapper (free for XLA) ------------------
    patches = x[:, :Tt, :Ft].reshape(B, Nt, pt, Nf, pf)
    patches = patches.transpose(0, 1, 3, 2, 4).reshape(M, dim)

    # Row tile: multiple of 8 (sublane granularity), padded so the grid is exact.
    tm = min(tile_m, M)
    tm = max(8, (tm // 8) * 8)
    Mp = pl.cdiv(M, tm) * tm
    if Mp != M:
        patches = jnp.pad(patches, ((0, Mp - M), (0, 0)))

    wt = w.T                        # (dim, d_model): output dim on lanes
    bias = b.reshape(1, d_model)

    out = pl.pallas_call(
        _patch_proj_kernel,
        out_shape=jax.ShapeDtypeStruct((Mp, d_model), x.dtype),
        grid_spec=pltpu.PrefetchScalarGridSpec(
            num_scalar_prefetch=0,
            grid=(Mp // tm,),
            in_specs=[
                pl.BlockSpec((tm, dim), lambda i: (i, 0)),       # row tile
                pl.BlockSpec((dim, d_model), lambda i: (0, 0)),  # full weight
                pl.BlockSpec((1, d_model), lambda i: (0, 0)),    # bias
            ],
            out_specs=pl.BlockSpec((tm, d_model), lambda i: (i, 0)),
        ),
        compiler_params=pltpu.CompilerParams(
            dimension_semantics=("parallel",)),
    )(patches, wt, bias)

    return out[:M].reshape(B, N, d_model)


def patch_embed_ref(x, w, b, *, pt, pf):
    """Pure-JAX reference (mirrors the PyTorch module exactly)."""
    B, T, F = x.shape
    Tt = (T // pt) * pt
    Ft = (F // pf) * pf
    p = x[:, :Tt, :Ft].reshape(B, Tt // pt, pt, Ft // pf, pf)
    p = p.transpose(0, 1, 3, 2, 4).reshape(B, -1, pt * pf)
    return p @ w.T + b


if __name__ == "__main__":
    # Small, module-consistent shapes.  T and F are NOT multiples of the patch
    # sizes so the truncation path of the forward is exercised.
    B, T, F = 2, 30, 18
    pt, pf, d_model = 4, 4, 128        # dim = pt*pf = 16
    dim = pt * pf

    key = jax.random.PRNGKey(0)
    kx, kw, kb = jax.random.split(key, 3)
    x = jax.random.normal(kx, (B, T, F), jnp.float32)
    w = jax.random.normal(kw, (d_model, dim), jnp.float32) * (1.0 / dim ** 0.5)
    b = jax.random.normal(kb, (d_model,), jnp.float32) * 0.02

    out = patch_embed_forward(x, w, b, pt=pt, pf=pf)
    jax.block_until_ready(out)

    ref = patch_embed_ref(x, w, b, pt=pt, pf=pf)
    N = (T // pt) * (F // pf)
    assert out.shape == (B, N, d_model), out.shape
    assert bool(jnp.all(jnp.isfinite(out)))
    assert bool(jnp.allclose(out, ref, atol=1e-4, rtol=1e-4)), \
        float(jnp.max(jnp.abs(out - ref)))
    print("KERNEL_OK")
</pallas_src>

<mosaic_0001>
module attributes {stable_mosaic.version = 11 : i64} {
  func.func @_patch_proj_kernel(%arg0: i32, %arg1: memref<56x16xf32, #tpu.memory_space<vmem>>, %arg2: memref<16x128xf32, #tpu.memory_space<vmem>>, %arg3: memref<1x128xf32, #tpu.memory_space<vmem>>, %arg4: memref<56x128xf32, #tpu.memory_space<vmem>>) attributes {dimension_semantics = [#tpu.dimension_semantics<parallel>], iteration_bounds = array<i64: 1>, scalar_prefetch = 0 : i64, scratch_operands = 0 : i64, tpu.core_type = #tpu.core_type<tc>, window_params = [{transform_indices = @transform_0, window_bounds = array<i64: 56, 16>}, {pipeline_mode = #tpu.pipeline_mode<synchronous>, transform_indices = @transform_1, window_bounds = array<i64: 16, 128>}, {pipeline_mode = #tpu.pipeline_mode<synchronous>, transform_indices = @transform_2, window_bounds = array<i64: 1, 128>}, {transform_indices = @transform_3, window_bounds = array<i64: 56, 128>}]} {
    %c0 = arith.constant 0 : index
    %c0_0 = arith.constant 0 : index
    %0 = vector.load %arg1[%c0, %c0_0] : memref<56x16xf32, #tpu.memory_space<vmem>>, vector<56x16xf32>
    %c0_1 = arith.constant 0 : index
    %c0_2 = arith.constant 0 : index
    %1 = vector.load %arg2[%c0_1, %c0_2] : memref<16x128xf32, #tpu.memory_space<vmem>>, vector<16x128xf32>
    %cst = arith.constant dense<0.000000e+00> : vector<56x128xf32>
    %2 = tpu.matmul %0, %1, %cst {dimension_numbers = #tpu.dot_dimension_numbers<[1], [0], [0], [1], [0, 0, 1, 1], [], []>} : vector<56x16xf32>, vector<16x128xf32>, vector<56x128xf32> -> vector<56x128xf32>
    %c0_3 = arith.constant 0 : index
    %c0_4 = arith.constant 0 : index
    %3 = vector.load %arg3[%c0_3, %c0_4] : memref<1x128xf32, #tpu.memory_space<vmem>>, vector<1x128xf32>
    %4 = vector.broadcast %3 : vector<1x128xf32> to vector<56x128xf32>
    %5 = arith.addf %2, %4 : vector<56x128xf32>
    %c0_5 = arith.constant 0 : index
    %c0_6 = arith.constant 0 : index
    %6 = vector.load %arg4[%c0_5, %c0_6] : memref<56x128xf32, #tpu.memory_space<vmem>>, vector<56x128xf32>
    tpu.vector_store %arg4[%c0_5, %c0_6], %5 {strides = array<i32>} : memref<56x128xf32, #tpu.memory_space<vmem>>, vector<56x128xf32>,
    return
  }
  func.func @transform_0(%arg0: i32) -> (i32, i32) {
    %c0_i32 = arith.constant 0 : i32
    %c0_i32_0 = arith.constant 0 : i32
    return %arg0, %c0_i32 : i32, i32
  }
  func.func @transform_1(%arg0: i32) -> (i32, i32) {
    %c0_i32 = arith.constant 0 : i32
    %c0_i32_0 = arith.constant 0 : i32
    %c0_i32_1 = arith.constant 0 : i32
    return %c0_i32, %c0_i32_0 : i32, i32
  }
  func.func @transform_2(%arg0: i32) -> (i32, i32) {
    %c0_i32 = arith.constant 0 : i32
    %c0_i32_0 = arith.constant 0 : i32
    %c0_i32_1 = arith.constant 0 : i32
    return %c0_i32, %c0_i32_0 : i32, i32
  }
  func.func @transform_3(%arg0: i32) -> (i32, i32) {
    %c0_i32 = arith.constant 0 : i32
    %c0_i32_0 = arith.constant 0 : i32
    return %arg0, %c0_i32 : i32, i32
  }
}

</mosaic_0001>

<bundles_post_ra>
// kernel: tpu_custom_call.1
= control target key start
LH: loop header
LB: loop body
LE: loop exit
PB: predicated region body
PF: predicated region fallthrough
CT: control target
= control target key end

     0   :  { %v253_v2 = vmov 0.0|0.0   ;;  %vm254_vm0 = vmmov 0   ;;  %v255_v4 = vmov 0.0   ;;  %vm31_vm1 = vcmask 130048   ;;  %s335_s0 = inlined_call_operand.vmem [shape: f32[56,16], index: 0, kind: input, shape index: {}]   ;;  %s336_s1 = inlined_call_operand.vmem [shape: f32[16,128], index: 1, kind: input, shape index: {}]   ;;  %s337_s2 = inlined_call_operand.vmem [shape: f32[1,128], index: 2, kind: input, shape index: {}]   ;;  %s338_s3 = inlined_call_operand.hbm [shape: f32[56,128], index: 3, kind: output, shape index: {}]  }
   0x1   :  { %v22_v0 = vld [vmem:[%s336_s1] sm:$0xff]  ;;  %v23_v1 = vld [vmem:[%s336_s1 + $0x8] sm:$0xff]  ;;  %218 = vmatprep.subr.bf16.mxu0 %v253_v2  ;;  %221 = vmatprep.subr.bf16.mxu1 %v253_v2 }
   0x2   :  { %v219_v3 = vpack.c.bf16 %v23_v1, %v22_v0  ;;  %197 = vmatprep.mubr.msk.f32.mxu0 %vm254_vm0, %v255_v4  ;;  %209 = vmatprep.mubr.msk.f32.mxu1 %vm254_vm0, %v255_v4  ;;  %v15_v5 = vld [vmem:[%s335_s0] sm:$0xff] }
   0x3   :  { %v19_v6 = vld [vmem:[%s335_s0 + $0x20] sm:$0xff] }
   0x4   :  { %220 = vmatpush3.bf16.msra.mxu0 %v219_v3  ;;  %222 = vmatpush3.bf16.msra.mxu1 %v219_v3 }
   0x5   :  { %8 = vsyncpa [#allocation3], 0  ;;  %v16_v7 = vld [vmem:[%s335_s0 + $0x8] sm:$0xff]  ;;  %v17_v9 = vld [vmem:[%s335_s0 + $0x10] sm:$0xff] }
   0x6   :  { %v20_v8 = vld [vmem:[%s335_s0 + $0x28] sm:$0xff]  ;;  %v21_v10 = vld [vmem:[%s335_s0 + $0x30] sm:$0xff]  ;;  %v18_v11 = vld [vmem:[%s335_s0 + $0x18] sm:$0xff]  ;;  %s256_s0 = smov [#allocation2]  }
   0x7   :  { %198 = vmatmul.mubr.msk.f32.vlgmr.msra.gmra.mrb[0].mxu0 %vm31_vm1, %v15_v5  ;;  %210 = vmatmul.mubr.msk.f32.vlgmr.msra.gmra.mrb[0].mxu1 %vm31_vm1, %v19_v6  ;;  %v176_v12 = vld [vmem:[%s337_s2] ss:$0 sm:$0xff]  ;;  %s165_s2 = sshll.u32 %s256_s0, 4  ;;  %s166_s2 = int_to_ptr.vmem [resolvable:$true] %s165_s2 }
   0x8   :  { %200 = vmatprep.mubr.msk.f32.mxu0 %vm254_vm0, %v255_v4  ;;  %212 = vmatprep.mubr.msk.f32.mxu1 %vm254_vm0, %v255_v4  ;;  %s229_s4 = scalar_lea.vmem %s166_s2, 896  ;;  %p234_p1 = scmp.lt.s32.totalorder %s166_s2, %s166_s2 }
   0x9   :  { %p230_p0 = scmp.ne.s32.totalorder %s166_s2, %s229_s4  ;;  %p235_p2 = scmp.lt.s32.totalorder %s229_s4, %s229_s4 }
   0xb   :  { %201 = vmatmul.mubr.msk.f32.gmra.mrb[2].mxu0 %vm31_vm1, %v16_v7  ;;  %213 = vmatmul.mubr.msk.f32.gmra.mrb[2].mxu1 %vm31_vm1, %v20_v8  ;;  %p236_p3 = por %p235_p2, %p234_p1 }
   0xc   :  { %203 = vmatprep.mubr.msk.f32.mxu0 %vm254_vm0, %v255_v4  ;;  %215 = vmatprep.mubr.msk.f32.mxu1 %vm254_vm0, %v255_v4 }
   0xd   :  { %p237_p4 = pnand %p236_p3, %p230_p0 }
   0xf   :  { %204 = vmatmul.mubr.msk.f32.gmra.mrb[4].mxu0 %vm31_vm1, %v17_v9  ;;  %216 = vmatmul.mubr.msk.f32.gmra.mrb[4].mxu1 %vm31_vm1, %v21_v10 }
  0x10   :  { %206 = vmatprep.mubr.msk.f32.mxu0 %vm254_vm0, %v255_v4 }
  0x13   :  { %207 = vmatmul.mubr.msk.f32.gmra.mrb[6].mxu0 %vm31_vm1, %v18_v11 }
  0xda   :  { %v119_v13 = vpop.f32.mrb[0].mxu0  ;;  %v139_v14 = vpop.f32.mrb[0].mxu1 }
  0xdb   :  { %v120_v15 = vadd.f32 %v176_v12, %v119_v13  ;;  %v199_v16 = vpop.f32.mrb[1].mxu0  ;;  %v140_v17 = vadd.f32 %v176_v12, %v139_v14  ;;  %v211_v18 = vpop.f32.mrb[1].mxu1 }
  0xdd   :  { %153 = vst [vmem:[#allocation2] sm:$0xff] %v120_v15  ;;  %157 = vst [vmem:[#allocation2 + $0x20] sm:$0xff] %v140_v17 }
  0xde   :  { %v124_v19 = vpop.f32.mrb[2].mxu0  ;;  %v144_v20 = vpop.f32.mrb[2].mxu1 }
  0xdf   :  { %v125_v21 = vadd.f32 %v176_v12, %v124_v19  ;;  %v202_v22 = vpop.f32.mrb[3].mxu0  ;;  %v145_v23 = vadd.f32 %v176_v12, %v144_v20  ;;  %v214_v24 = vpop.f32.mrb[3].mxu1 }
  0xe1   :  { %154 = vst [vmem:[#allocation2 + $0x8] sm:$0xff] %v125_v21  ;;  %158 = vst [vmem:[#allocation2 + $0x28] sm:$0xff] %v145_v23 }
  0xe2   :  { %v129_v25 = vpop.f32.mrb[4].mxu0  ;;  %v149_v26 = vpop.f32.mrb[4].mxu1 }
  0xe3   :  { %v130_v27 = vadd.f32 %v176_v12, %v129_v25  ;;  %v205_v28 = vpop.f32.mrb[5].mxu0  ;;  %v150_v29 = vadd.f32 %v176_v12, %v149_v26  ;;  %v217_v30 = vpop.f32.mrb[5].mxu1 }
  0xe5   :  { %155 = vst [vmem:[#allocation2 + $0x10] sm:$0xff] %v130_v27  ;;  %159 = vst [vmem:[#allocation2 + $0x30] sm:$0xff] %v150_v29 }
  0xe6   :  { %v134_v31 = vpop.f32.mrb[6].mxu0 }
  0xe7   :  { %v135_v32 = vadd.f32 %v176_v12, %v134_v31  ;;  %v208_v33 = vpop.f32.mrb[7].mxu0 }
  0xe9   :  { %156 = vst [vmem:[#allocation2 + $0x18] sm:$0xff] %v135_v32 }
  0xea   :  { %240 = shalt.err (!%p237_p4)
}
  0xeb   :  { %s241_s7 = scalar_lea.hbm %s338_s3, 896 }
  0xec   :  { %p242_p5 = scmp.ne.s32.totalorder %s338_s3, %s241_s7  ;;  %p245_p6 = scmp.lt.u32.totalorder %s241_s7, %s338_s3 }
  0xee   :  { %p247_p7 = pnand %p245_p6, %p242_p5 }
  0xf0   :  { %250 = shalt.err (!%p247_p7)
}
  0xf1   :  { %s257_s12 = smov 128   ;;  %s258_s13 = smov 8  }
  0xf2   :  { %171 = dma.vmem_to_hbm [thread:$0]  %s166_s2, 896, %s338_s3, [#allocation3], %s257_s12, %s257_s12, %s258_s13  }
  0xf3   :  { %251 = dma.done.wait [#allocation3], 896  }
  0xf4   :  { %252 = vsyncadd [#allocation3], 4294966400 }
  0xf5   :  { %175 = vsyncpa [#allocation3], 1 }

</bundles_post_ra>
